<compile_context>
chip_gen: v5e
topology: v5e:2x2
jax: 0.10.0
libtpu: 0.0.40
codegen_flags: <defaults>
</compile_context>

<pallas_src>
import jax
import jax.numpy as jnp
from jax.experimental import pallas as pl
from jax.experimental.pallas import tpu as pltpu


_LANES = 128
_SUBLANES = 8


def _round_up(x, m):
    return ((x + m - 1) // m) * m


def _head_kernel(x_ref, w1_ref, b1_ref, w2_ref, b2_ref, o_ref):
    # x: [TB, D_in], w1: [D_in, Hp], b1: [1, Hp], w2: [Hp, Cp], b2: [1, Cp], o: [TB, Cp]
    # f32 accumulation (x.float() semantics); matmul operands in native/weight dtype.
    h = jnp.dot(x_ref[...], w1_ref[...], preferred_element_type=jnp.float32) + b1_ref[...]
    h = jnp.tanh(h)                      # torch.tanh in f32 (EUP; v5e has no bf16 EUP)
    h = h.astype(w2_ref.dtype)           # feed the MXU in the weight dtype (no-op for f32)
    y = jnp.dot(h, w2_ref[...], preferred_element_type=jnp.float32) + b2_ref[...]
    o_ref[...] = y.astype(o_ref.dtype)


def prediction_classification_forward(features, w_dense, b_dense, w_out, b_out,
                                      *, tb_max=512, target_grid_steps=8):
    """features: [B, D_in]; w_dense: [D_in, H]; b_dense: [H]; w_out: [H, C]; b_out: [C]."""
    B, D_in = features.shape
    H = w_dense.shape[1]
    C = w_out.shape[1]

    # ---- weight-side lane padding: H and C up to multiples of 128 (zero-padded) ----
    H_pad = _round_up(max(H, _LANES), _LANES)
    C_pad = _round_up(max(C, _LANES), _LANES)
    w1p = jnp.zeros((D_in, H_pad), w_dense.dtype).at[:, :H].set(w_dense)
    b1p = jnp.zeros((1, H_pad), jnp.float32).at[:, :H].set(b_dense.astype(jnp.float32))
    w2p = jnp.zeros((H_pad, C_pad), w_out.dtype).at[:H, :C].set(w_out)
    b2p = jnp.zeros((1, C_pad), jnp.float32).at[:, :C].set(b_out.astype(jnp.float32))

    x_isz = jnp.dtype(features.dtype).itemsize
    w_isz = jnp.dtype(w_dense.dtype).itemsize
    o_isz = 4  # f32 output

    # ---- per-generation VMEM budget (v7x: 64 MiB/TC, v5e/v6e: 128 MiB) ----
    try:
        phys_vmem = pltpu.get_tpu_info().vmem_capacity_bytes
    except Exception:
        phys_vmem = 64 << 20  # v7x-safe fallback
    budget = int(phys_vmem * 0.75)

    weights_bytes = (D_in * H_pad + H_pad * C_pad) * w_isz + (H_pad + C_pad) * 4

    # ---- batch tile: aim for >= target_grid_steps grid steps, fit the VMEM budget ----
    TB = _round_up(max(pl.cdiv(B, target_grid_steps), _SUBLANES), _SUBLANES)
    TB = min(TB, tb_max, _round_up(B, _SUBLANES))
    per_row = 2 * D_in * x_isz + 2 * C_pad * o_isz        # double-buffered x + out tiles
    avail = max(budget - weights_bytes, per_row * _SUBLANES)
    TB_fit = max(_SUBLANES, (avail // per_row) // _SUBLANES * _SUBLANES)
    TB = max(_SUBLANES, min(TB, TB_fit))

    grid = (pl.cdiv(B, TB),)   # partial last block: padded on read, masked on write

    vmem_need = weights_bytes + TB * per_row
    vmem_limit = int(min(budget, max(32 << 20, vmem_need + vmem_need // 4)))

    cost = pl.CostEstimate(
        flops=2 * B * (D_in * H_pad + H_pad * C_pad),
        transcendentals=B * H_pad,
        bytes_accessed=(B * D_in * x_isz
                        + D_in * H_pad * w_isz
                        + H_pad * C_pad * w_isz
                        + B * C_pad * o_isz),
    )

    resident = dict(pipeline_mode=pl.Buffered(1))   # single-buffer grid-invariant operands

    out = pl.pallas_call(
        _head_kernel,
        out_shape=jax.ShapeDtypeStruct((B, C_pad), jnp.float32),
        grid_spec=pltpu.PrefetchScalarGridSpec(
            num_scalar_prefetch=0,
            grid=grid,
            in_specs=[
                pl.BlockSpec((TB, D_in), lambda i: (i, 0)),                   # x (pipelined)
                pl.BlockSpec((D_in, H_pad), lambda i: (0, 0), **resident),    # w1 resident
                pl.BlockSpec((1, H_pad), lambda i: (0, 0), **resident),       # b1 resident
                pl.BlockSpec((H_pad, C_pad), lambda i: (0, 0), **resident),   # w2 resident
                pl.BlockSpec((1, C_pad), lambda i: (0, 0), **resident),       # b2 resident
            ],
            out_specs=pl.BlockSpec((TB, C_pad), lambda i: (i, 0)),
        ),
        compiler_params=pltpu.CompilerParams(
            dimension_semantics=("parallel",),   # megacore sharding on v7x, neutral elsewhere
            vmem_limit_bytes=vmem_limit,
        ),
        cost_estimate=cost,
    )(features, w1p, b1p, w2p, b2p)

    return out[:, :C]


def _reference(features, w_dense, b_dense, w_out, b_out):
    x = features.astype(jnp.float32)
    h = jnp.tanh(x @ w_dense.astype(jnp.float32) + b_dense.astype(jnp.float32))
    return h @ w_out.astype(jnp.float32) + b_out.astype(jnp.float32)


if __name__ == "__main__":
    # Small shapes consistent with the module: batch=8, input_size=32,
    # hidden_size=32, num_classes=8.
    B, D_IN, HID, NCLS = 8, 32, 32, 8

    key = jax.random.PRNGKey(0)
    k_x, k_w1, k_b1, k_w2, k_b2 = jax.random.split(key, 5)

    features = jax.random.normal(k_x, (B, D_IN), dtype=jnp.float32)

    # Deterministic parameter init (Linear-like scale), stored as [in, out].
    w_dense = jax.random.normal(k_w1, (D_IN, HID), dtype=jnp.float32) * (1.0 / jnp.sqrt(D_IN))
    b_dense = jax.random.normal(k_b1, (HID,), dtype=jnp.float32) * 0.01
    w_out = jax.random.normal(k_w2, (HID, NCLS), dtype=jnp.float32) * (1.0 / jnp.sqrt(HID))
    b_out = jax.random.normal(k_b2, (NCLS,), dtype=jnp.float32) * 0.01

    out = prediction_classification_forward(features, w_dense, b_dense, w_out, b_out)
    out = jax.block_until_ready(out)

    ref = _reference(features, w_dense, b_dense, w_out, b_out)
    assert out.shape == (B, NCLS)
    assert jnp.allclose(out, ref, atol=1e-5, rtol=1e-5), "mismatch vs reference"

    print("KERNEL_OK")
</pallas_src>

<mosaic_0001>
module attributes {stable_mosaic.version = 11 : i64} {
  func.func @_head_kernel(%arg0: i32, %arg1: memref<8x32xf32, #tpu.memory_space<vmem>>, %arg2: memref<32x128xf32, #tpu.memory_space<vmem>>, %arg3: memref<1x128xf32, #tpu.memory_space<vmem>>, %arg4: memref<128x128xf32, #tpu.memory_space<vmem>>, %arg5: memref<1x128xf32, #tpu.memory_space<vmem>>, %arg6: memref<8x128xf32, #tpu.memory_space<vmem>>) attributes {dimension_semantics = [#tpu.dimension_semantics<parallel>], iteration_bounds = array<i64: 1>, scalar_prefetch = 0 : i64, scratch_operands = 0 : i64, tpu.core_type = #tpu.core_type<tc>, window_params = [{transform_indices = @transform_0, window_bounds = array<i64: 8, 32>}, {pipeline_mode = #tpu.pipeline_mode<synchronous>, transform_indices = @transform_1, window_bounds = array<i64: 32, 128>}, {pipeline_mode = #tpu.pipeline_mode<synchronous>, transform_indices = @transform_2, window_bounds = array<i64: 1, 128>}, {pipeline_mode = #tpu.pipeline_mode<synchronous>, transform_indices = @transform_3, window_bounds = array<i64: 128, 128>}, {pipeline_mode = #tpu.pipeline_mode<synchronous>, transform_indices = @transform_4, window_bounds = array<i64: 1, 128>}, {transform_indices = @transform_5, window_bounds = array<i64: 8, 128>}]} {
    %c0 = arith.constant 0 : index
    %c0_0 = arith.constant 0 : index
    %0 = vector.load %arg1[%c0, %c0_0] : memref<8x32xf32, #tpu.memory_space<vmem>>, vector<8x32xf32>
    %c0_1 = arith.constant 0 : index
    %c0_2 = arith.constant 0 : index
    %1 = vector.load %arg2[%c0_1, %c0_2] : memref<32x128xf32, #tpu.memory_space<vmem>>, vector<32x128xf32>
    %cst = arith.constant dense<0.000000e+00> : vector<8x128xf32>
    %2 = tpu.matmul %0, %1, %cst {dimension_numbers = #tpu.dot_dimension_numbers<[1], [0], [0], [1], [0, 0, 1, 1], [], []>} : vector<8x32xf32>, vector<32x128xf32>, vector<8x128xf32> -> vector<8x128xf32>
    %c0_3 = arith.constant 0 : index
    %c0_4 = arith.constant 0 : index
    %3 = vector.load %arg3[%c0_3, %c0_4] : memref<1x128xf32, #tpu.memory_space<vmem>>, vector<1x128xf32>
    %4 = vector.broadcast %3 : vector<1x128xf32> to vector<8x128xf32>
    %5 = arith.addf %2, %4 : vector<8x128xf32>
    %6 = math.tanh %5 : vector<8x128xf32>
    %c0_5 = arith.constant 0 : index
    %c0_6 = arith.constant 0 : index
    %7 = vector.load %arg4[%c0_5, %c0_6] : memref<128x128xf32, #tpu.memory_space<vmem>>, vector<128x128xf32>
    %cst_7 = arith.constant dense<0.000000e+00> : vector<8x128xf32>
    %8 = tpu.matmul %6, %7, %cst_7 {dimension_numbers = #tpu.dot_dimension_numbers<[1], [0], [0], [1], [0, 0, 1, 1], [], []>} : vector<8x128xf32>, vector<128x128xf32>, vector<8x128xf32> -> vector<8x128xf32>
    %c0_8 = arith.constant 0 : index
    %c0_9 = arith.constant 0 : index
    %9 = vector.load %arg5[%c0_8, %c0_9] : memref<1x128xf32, #tpu.memory_space<vmem>>, vector<1x128xf32>
    %10 = vector.broadcast %9 : vector<1x128xf32> to vector<8x128xf32>
    %11 = arith.addf %8, %10 : vector<8x128xf32>
    %c0_10 = arith.constant 0 : index
    %c0_11 = arith.constant 0 : index
    %12 = vector.load %arg6[%c0_10, %c0_11] : memref<8x128xf32, #tpu.memory_space<vmem>>, vector<8x128xf32>
    tpu.vector_store %arg6[%c0_10, %c0_11], %11 {strides = array<i32>} : memref<8x128xf32, #tpu.memory_space<vmem>>, vector<8x128xf32>,
    return
  }
  func.func @transform_0(%arg0: i32) -> (i32, i32) {
    %c0_i32 = arith.constant 0 : i32
    %c0_i32_0 = arith.constant 0 : i32
    return %arg0, %c0_i32 : i32, i32
  }
  func.func @transform_1(%arg0: i32) -> (i32, i32) {
    %c0_i32 = arith.constant 0 : i32
    %c0_i32_0 = arith.constant 0 : i32
    %c0_i32_1 = arith.constant 0 : i32
    return %c0_i32, %c0_i32_0 : i32, i32
  }
  func.func @transform_2(%arg0: i32) -> (i32, i32) {
    %c0_i32 = arith.constant 0 : i32
    %c0_i32_0 = arith.constant 0 : i32
    %c0_i32_1 = arith.constant 0 : i32
    return %c0_i32, %c0_i32_0 : i32, i32
  }
  func.func @transform_3(%arg0: i32) -> (i32, i32) {
    %c0_i32 = arith.constant 0 : i32
    %c0_i32_0 = arith.constant 0 : i32
    %c0_i32_1 = arith.constant 0 : i32
    return %c0_i32, %c0_i32_0 : i32, i32
  }
  func.func @transform_4(%arg0: i32) -> (i32, i32) {
    %c0_i32 = arith.constant 0 : i32
    %c0_i32_0 = arith.constant 0 : i32
    %c0_i32_1 = arith.constant 0 : i32
    return %c0_i32, %c0_i32_0 : i32, i32
  }
  func.func @transform_5(%arg0: i32) -> (i32, i32) {
    %c0_i32 = arith.constant 0 : i32
    %c0_i32_0 = arith.constant 0 : i32
    return %arg0, %c0_i32 : i32, i32
  }
}

</mosaic_0001>

<bundles_post_ra>
// kernel: tpu_custom_call.1
= control target key start
LH: loop header
LB: loop body
LE: loop exit
PB: predicated region body
PF: predicated region fallthrough
CT: control target
= control target key end

     0   :  { %10 = vsyncpa [#allocation3], 0  ;;  %s326_s0 = inlined_call_operand.hbm [shape: f32[8,32], index: 0, kind: input, shape index: {}]   ;;  %s327_s1 = inlined_call_operand.hbm [shape: f32[32,128], index: 1, kind: input, shape index: {}]   ;;  %s328_s2 = inlined_call_operand.vmem [shape: f32[1,128], index: 2, kind: input, shape index: {}]   ;;  %s329_s3 = inlined_call_operand.hbm [shape: f32[128,128], index: 3, kind: input, shape index: {}]   ;;  %s330_s4 = inlined_call_operand.vmem [shape: f32[1,128], index: 4, kind: input, shape index: {}]   ;;  %s331_s5 = inlined_call_operand.hbm [shape: f32[8,128], index: 5, kind: output, shape index: {}]  }
   0x1   :  { %11 = vsyncpa [#allocation6], 0  ;;  %s28_s20 = sshll.u32 %s327_s1, 4  ;;  %s29_s20 = int_to_ptr.hbm [resolvable:$true] %s28_s20 }
   0x2   :  { %12 = vsyncpa [#allocation4], 0  ;;  %s272_s21 = smov [#allocation5]   ;;  %s18_s25 = sshll.u32 %s326_s0, 4  ;;  %s19_s25 = int_to_ptr.hbm [resolvable:$true] %s18_s25 }
   0x3   :  { %s30_s22 = sshll.u32 %s272_s21, 4  ;;  %s273_s26 = smov 128   ;;  %s31_s22 = int_to_ptr.vmem [resolvable:$true] %s30_s22 }
   0x4   :  { %s274_s27 = smov 8   ;;  %s275_s28 = smov [#allocation2]  }
   0x5   :  { %36 = dma.hbm_to_vmem [thread:$0]  %s29_s20, 512, %s31_s22, [#allocation6], %s273_s26, %s273_s26, %s274_s27  }
   0x6   :  { %s20_s29 = sshll.u32 %s275_s28, 4  ;;  %s43_s7 = sshll.u32 %s329_s3, 4  ;;  %s21_s29 = int_to_ptr.vmem [resolvable:$true] %s20_s29  ;;  %s44_s7 = int_to_ptr.hbm [resolvable:$true] %s43_s7 }
   0x7   :  { %23 = dma.hbm_to_vmem [thread:$0]  %s19_s25, 128, %s21_s29, [#allocation3]  }
   0x8   :  { %s276_s1 = smov [#allocation7]  }
   0x9   :  { %s45_s8 = sshll.u32 %s276_s1, 4  ;;  %s46_s8 = int_to_ptr.vmem [resolvable:$true] %s45_s8 }
   0xa   :  { %51 = dma.hbm_to_vmem [thread:$0]  %s44_s7, 2048, %s46_s8, [#allocation6], %s273_s26, %s273_s26, %s274_s27  }
   0xb   :  { %266 = dma.done.wait [#allocation3], 128  }
   0xc   :  { %267 = vsyncadd [#allocation3], 4294967168 }
   0xd   :  { %268 = dma.done.wait [#allocation6], 2560  }
   0xe   :  { %269 = vsyncadd [#allocation6], 4294964736  ;;  %v70_v0 = vld [vmem:[#allocation5 + $0x18] sm:$0xff]  ;;  %v69_v1 = vld [vmem:[#allocation5 + $0x10] sm:$0xff]  ;;  %vm75_vm0 = vcmask 261120   ;;  %s277_s11 = smov [#allocation8]  }
   0xf   :  { %91 = vmatpush.msra.mxu0 %v70_v0  ;;  %v115_v2 = vld [vmem:[#allocation7 + $0x78] sm:$0xff]  ;;  %v68_v3 = vld [vmem:[#allocation5 + $0x8] sm:$0xff]  ;;  %v114_v4 = vld [vmem:[#allocation7 + $0x70] sm:$0xff]  ;;  %s146_s12 = sshll.u32 %s277_s11, 4  ;;  %s148_s15 = sshll.u32 %s331_s5, 4  ;;  %s147_s12 = int_to_ptr.vmem [resolvable:$true] %s146_s12  ;;  %s149_s15 = int_to_ptr.hbm [resolvable:$true] %s148_s15 }
  0x10   :  { %120 = vmatpush.msra.mxu1 %v115_v2  ;;  %v113_v5 = vld [vmem:[#allocation7 + $0x68] sm:$0xff]  ;;  %v67_v6 = vld [vmem:[#allocation5] sm:$0xff]  ;;  %v66_v7 = vld [vmem:[#allocation2] sm:$0xff] }
  0x11   :  { %92 = vmatpush.msra.mxu0 %v69_v1  ;;  %v112_v8 = vld [vmem:[#allocation7 + $0x60] sm:$0xff]  ;;  %v111_v9 = vld [vmem:[#allocation7 + $0x58] sm:$0xff]  ;;  %v110_v10 = vld [vmem:[#allocation7 + $0x50] sm:$0xff] }
  0x12   :  { %121 = vmatpush.msra.mxu1 %v114_v4  ;;  %v109_v11 = vld [vmem:[#allocation7 + $0x48] sm:$0xff]  ;;  %v108_v12 = vld [vmem:[#allocation7 + $0x40] sm:$0xff]  ;;  %v107_v13 = vld [vmem:[#allocation7 + $0x38] sm:$0xff] }
  0x13   :  { %93 = vmatpush.msra.mxu0 %v68_v3  ;;  %v106_v14 = vld [vmem:[#allocation7 + $0x30] sm:$0xff]  ;;  %v105_v15 = vld [vmem:[#allocation7 + $0x28] sm:$0xff]  ;;  %v104_v16 = vld [vmem:[#allocation7 + $0x20] sm:$0xff] }
  0x14   :  { %122 = vmatpush.msra.mxu1 %v113_v5  ;;  %v103_v17 = vld [vmem:[#allocation7 + $0x18] sm:$0xff]  ;;  %v102_v18 = vld [vmem:[#allocation7 + $0x10] sm:$0xff]  ;;  %v101_v19 = vld [vmem:[#allocation7 + $0x8] sm:$0xff] }
  0x15   :  { %94 = vmatpush.msra.mxu0 %v67_v6  ;;  %v100_v20 = vld [vmem:[#allocation7] sm:$0xff]  ;;  %v166_v21 = vld [vmem:[%s328_s2] ss:$0 sm:$0xff] }
  0x16   :  { %159 = vmatmul.msk.f32.vlgmr.msra.gmra.mxu0 %vm75_vm0, %v66_v7  ;;  %123 = vmatpush.msra.mxu1 %v112_v8  ;;  %v167_v25 = vld [vmem:[%s330_s4] ss:$0 sm:$0xff] }
  0x18   :  { %124 = vmatpush.msra.mxu1 %v111_v9 }
  0x1a   :  { %125 = vmatpush.msra.mxu1 %v110_v10 }
  0x1c   :  { %126 = vmatpush.msra.mxu1 %v109_v11 }
  0x1e   :  { %127 = vmatpush.msra.mxu1 %v108_v12 }
  0x20   :  { %128 = vmatpush.msra.mxu1 %v107_v13 }
  0x22   :  { %129 = vmatpush.msra.mxu1 %v106_v14 }
  0x24   :  { %130 = vmatpush.msra.mxu1 %v105_v15 }
  0x26   :  { %131 = vmatpush.msra.mxu1 %v104_v16 }
  0x28   :  { %132 = vmatpush.msra.mxu1 %v103_v17 }
  0x2a   :  { %133 = vmatpush.msra.mxu1 %v102_v18 }
  0x2c   :  { %134 = vmatpush.msra.mxu1 %v101_v19 }
  0x2e   :  { %135 = vmatpush.msra.mxu1 %v100_v20 }
  0x93   :  { %v96_v22 = vpop.f32.mrf.mxu0 }
  0x94   :  { %v97_v23 = vadd.f32 %v166_v21, %v96_v22 }
  0x96   :  { %168 = vtanh.f32 %v97_v23 }
  0x9c   :  { %v169_v24 = vpop.eup %168 }
  0x9d   :  { %136 = vmatmul.f32.vlgmr.msra.gmra.mxu1 %v169_v24 }
 0x11a   :  { %v137_v26 = vpop.f32.mrf.mxu1 }
 0x11b   :  { %v138_v27 = vadd.f32 %v167_v25, %v137_v26 }
 0x11d   :  { %140 = vst [vmem:[#allocation8] sm:$0xff] %v138_v27 }
 0x11e   :  { %151 = dma.vmem_to_hbm [thread:$0]  %s147_s12, 128, %s149_s15, [#allocation4]  }
 0x11f   :  { %270 = dma.done.wait [#allocation4], 128  }
 0x120   :  { %271 = vsyncadd [#allocation4], 4294967168 }
 0x121   :  { %156 = vsyncpa [#allocation3], 1 }
 0x122   :  { %157 = vsyncpa [#allocation6], 1 }
 0x123   :  { %158 = vsyncpa [#allocation4], 1 }

</bundles_post_ra>
